<compile_context>
chip_gen: v5e
topology: v5e:2x2
jax: 0.10.0
libtpu: 0.0.40
codegen_flags: <defaults>
</compile_context>

<pallas_src>
import functools

import jax
import jax.numpy as jnp
from jax.experimental import pallas as pl
from jax.experimental.pallas import tpu as pltpu

LANE = 128


def _round_up(x, m):
    return ((x + m - 1) // m) * m


def _pick_batch_block(n_batch, out_lens, target_rows=256):
    """Batch items per grid step: aim for >= target_rows MXU LHS rows per matmul
    while keeping >= 2 grid steps (v7x megacore) and a cheap (B,L,C)->(B*L,C)
    collapse (L a sublane multiple)."""
    if n_batch <= 1:
        return 1
    if any(l % 8 for l in out_lens):
        return 1                     # sublane-unaligned collapse -> one item per step
    target = max(1, -(-target_rows // min(out_lens)))
    divs = [b for b in range(1, n_batch + 1) if n_batch % b == 0 and b <= target]
    multi = [b for b in divs if n_batch // b >= 2]
    if multi:
        return max(multi)
    return max(divs) if divs else 1


def _fused_conv_stack_kernel(x_ref, *rest, meta, n_layers, K, pad, r0, b_blk,
                             l0, c0, c_pad_max, compute_dtype):
    """Fused stack of (Conv1d + folded bias/BN shift [+ ReLU]) layers.

    x_ref : (B_blk, L0, C0)   compact input block (no channel / spatial padding)
    rest  : w_0, s_0, ..., w_{n-1}, s_{n-1}, o_ref, act
      w_i : (K*Cin_pad_i, Cout_pad_i)  K-folded conv weight (BN scale folded in), bf16
      s_i : (1, Cout_pad_i)            folded shift (bias*scale + beta - mean*scale), f32
      o_ref : (B_blk, L_final, C_last) compact output block
      act   : (B_blk, R, C_pad_max) f32 VMEM scratch holding the padded activation
    meta  : per-layer static (cin_pad, cout_pad, cout, l_out, relu, tail_zero)
    """
    o_ref = rest[2 * n_layers]
    act = rest[2 * n_layers + 1]
    cin_pad0 = meta[0][0]

    # ---- stage layer-0 input: spatial + channel zero padding happens here in VMEM ----
    if pad > 0:
        # head spatial-pad rows (full width, covers every layer's read range)
        act[:, r0 - pad:r0, :] = jnp.zeros((b_blk, pad, c_pad_max), act.dtype)
    # zero the content slab + trailing pad rows, then masked-write the real channels
    act[:, r0:r0 + l0 + pad, 0:cin_pad0] = jnp.zeros(
        (b_blk, l0 + pad, cin_pad0), act.dtype)
    act[:, r0:r0 + l0, 0:c0] = x_ref[...].astype(act.dtype)

    for i in range(n_layers):
        cin_pad, cout_pad, cout, l_out, relu, tail_zero = meta[i]
        w_ref, s_ref = rest[2 * i], rest[2 * i + 1]
        rows = b_blk * l_out

        # im2col LHS: K lane-aligned 128-wide slices of the padded activation,
        # concatenated along lanes -> ONE matmul per layer with a K*Cin_pad-deep
        # contraction (instead of K accumulated 128-deep dots).
        pieces = [act[:, r0 - pad + k:r0 - pad + k + l_out, 0:cin_pad]
                  for k in range(K)]
        lhs = jnp.concatenate(pieces, axis=-1).reshape(rows, K * cin_pad)

        y = jnp.dot(lhs.astype(compute_dtype), w_ref[...],
                    preferred_element_type=jnp.float32)   # bf16 MXU, f32 accumulate
        y = y + s_ref[...]                                 # folded bias + BN (eval)
        if relu:
            y = jnp.maximum(y, 0.0)

        if i == n_layers - 1:
            # Emit only the real channels: the HBM output stays compact.
            o_ref[...] = (y.reshape(b_blk, l_out, cout_pad)[:, :, 0:cout]
                          .astype(o_ref.dtype))
        else:
            # Stage intermediate activation at the sublane-aligned offset r0; the
            # zero-padded weight columns make channels [cout:cout_pad] exact zeros.
            act[:, r0:r0 + l_out, 0:cout_pad] = (
                y.reshape(b_blk, l_out, cout_pad).astype(act.dtype))
            if tail_zero:
                # Only emitted when a static check says these rows can be dirty
                # (never for "same" padding).
                act[:, r0 + l_out:r0 + l_out + pad, 0:cout_pad] = jnp.zeros(
                    (b_blk, pad, cout_pad), act.dtype)


def conv1d_layer_forward(x_ncl, params, *, kernel=3, stride=1, padding=1,
                         bnrelu_final=True, eps=1e-5, compute_dtype=jnp.bfloat16):
    """Equivalent of Conv1dLayer.forward. x_ncl: (N, C, L) as in PyTorch."""
    assert stride == 1  # TODO(synk): strided conv not supported by the fused kernel.
    N, C0, L0 = (int(d) for d in x_ncl.shape)
    n_layers = len(params)
    K = int(params[0]["weight"].shape[2])
    assert K == kernel
    pad = int(padding)

    feat = [C0] + [int(p["weight"].shape[0]) for p in params]
    c_pads = [_round_up(c, LANE) for c in feat]
    c_pad_max = max(c_pads)

    # Per-layer spatial lengths (stride 1).
    lens = [L0]
    for _ in range(n_layers):
        lens.append(lens[-1] + 2 * pad - K + 1)
    assert all(l > 0 for l in lens), lens

    # ---- host side: NCL -> NLC only (compact; NO channel / spatial padding in HBM) ----
    x_nlc = jnp.transpose(x_ncl, (0, 2, 1))
    # TODO(synk): accept NCL directly (in-kernel transpose on the XLU) to drop this copy.

    # ---- fold conv bias + eval-mode BN into (K*Cin_pad, Cout_pad) weights + shift ----
    w_list, s_list, meta = [], [], []
    for i, p in enumerate(params):
        cout, cin, k_ = (int(d) for d in p["weight"].shape)
        assert (cin, k_) == (feat[i], K)
        apply_relu = (i < n_layers - 1) or bnrelu_final
        if apply_relu:
            # Conv followed by BatchNorm1d (eval) + ReLU -> exact affine fold.
            scale = p["bn"]["gamma"] * jax.lax.rsqrt(p["bn"]["running_var"] + eps)
            shift = (p["bias"] * scale + p["bn"]["beta"]
                     - p["bn"]["running_mean"] * scale)
        else:
            # Bare Conv1d (last layer with bnrelu_final=False): no BN, no ReLU.
            scale = jnp.ones((cout,), jnp.float32)
            shift = p["bias"].astype(jnp.float32)

        # W2[k*cin_pad + c, o] = weight[o, c, k] * scale[o]; zero-pad to lane multiples.
        w = jnp.transpose(p["weight"], (2, 1, 0)).astype(jnp.float32) * scale[None, None, :]
        w = jnp.pad(w, ((0, 0), (0, c_pads[i] - cin), (0, c_pads[i + 1] - cout)))
        w = w.reshape(K * c_pads[i], c_pads[i + 1]).astype(compute_dtype)
        sh = jnp.pad(shift.astype(jnp.float32), (0, c_pads[i + 1] - cout))
        sh = sh.reshape(1, c_pads[i + 1])
        w_list.append(w)
        s_list.append(sh)

        l_out = lens[i + 1]
        if i < n_layers - 1 and pad > 0:
            # Tail pad rows after this intermediate write are provably already zero
            # iff nothing longer/wider was staged earlier in the grid step
            # (always true for "same" padding -> no per-step zeroing emitted).
            covered = (l_out == lens[0] and c_pads[i + 1] <= c_pads[0]
                       and all(lens[j + 1] <= l_out for j in range(i)))
            tail_zero = not covered
        else:
            tail_zero = False
        meta.append((c_pads[i], c_pads[i + 1], feat[i + 1], l_out,
                     bool(apply_relu), bool(tail_zero)))

    # ---- batch blocking: >=256 LHS rows per matmul, but keep >=2 grid steps (v7x) ----
    b_blk = _pick_batch_block(N, lens[1:])
    grid = (N // b_blk,)

    # Activation scratch: content starts at a sublane-aligned row (unmasked stores).
    r0 = _round_up(pad, 8) if pad > 0 else 0
    rows_act = _round_up(r0 + max(lens[:n_layers]) + pad, 8)

    inputs = [x_nlc]
    in_specs = [pl.BlockSpec((b_blk, L0, C0), lambda n: (n, 0, 0))]
    for w, sh in zip(w_list, s_list):
        inputs += [w, sh]
        # Grid-invariant blocks: weights/shifts stay VMEM-resident, no per-step re-DMA.
        in_specs += [pl.BlockSpec(w.shape, lambda n: (0, 0)),
                     pl.BlockSpec(sh.shape, lambda n: (0, 0))]

    l_final, c_final = lens[-1], feat[-1]
    out_shape = jax.ShapeDtypeStruct((N, l_final, c_final), x_ncl.dtype)
    out_spec = pl.BlockSpec((b_blk, l_final, c_final), lambda n: (n, 0, 0))

    scratch_shapes = [pltpu.VMEM((b_blk, rows_act, c_pad_max), jnp.float32)]

    # VMEM budget guard (v7x: 64 MiB physical): only set an explicit limit when the
    # footprint may exceed the 32 MiB scoped default.
    est = (b_blk * rows_act * c_pad_max * 4
           + 2 * b_blk * (L0 * C0 + l_final * c_final) * x_nlc.dtype.itemsize
           + 2 * sum(int(w.size) * w.dtype.itemsize for w in w_list)
           + 2 * sum(int(s.size) * 4 for s in s_list))
    ck = dict(dimension_semantics=("parallel",))
    if est > 24 * (1 << 20):
        # TODO(synk): for very large channel counts, add a Cout-tile grid axis instead
        # of keeping every layer's full weight resident.
        ck["vmem_limit_bytes"] = int(min(2 * est, 64 * (1 << 20)))

    kernel_fn = functools.partial(
        _fused_conv_stack_kernel, meta=tuple(meta), n_layers=n_layers, K=K, pad=pad,
        r0=r0, b_blk=b_blk, l0=L0, c0=C0, c_pad_max=c_pad_max,
        compute_dtype=compute_dtype)

    out_nlc = pl.pallas_call(
        kernel_fn,
        out_shape=out_shape,
        grid=grid,
        in_specs=in_specs,
        out_specs=out_spec,
        scratch_shapes=scratch_shapes,
        compiler_params=pltpu.CompilerParams(**ck),
    )(*inputs)

    return jnp.transpose(out_nlc, (0, 2, 1))   # NLC -> NCL


def _reference_forward(x_ncl, params, *, kernel=3, stride=1, padding=1,
                       bnrelu_final=True, eps=1e-5):
    """Pure-JAX (XLA) reference for the PyTorch Conv1dLayer forward (eval-mode BN)."""
    del kernel
    y = x_ncl
    n = len(params)
    for i, p in enumerate(params):
        y = jax.lax.conv_general_dilated(
            y, p["weight"], window_strides=(stride,), padding=[(padding, padding)],
            dimension_numbers=("NCH", "OIH", "NCH"))
        y = y + p["bias"][None, :, None]
        if i < n - 1 or bnrelu_final:
            bn = p["bn"]
            y = (y - bn["running_mean"][None, :, None]) * jax.lax.rsqrt(
                bn["running_var"][None, :, None] + eps)
            y = y * bn["gamma"][None, :, None] + bn["beta"][None, :, None]
            y = jnp.maximum(y, 0.0)
    return y


def init_conv1d_layer_params(key, feat_dims, kernel=3):
    """Deterministic parameter init (PyTorch-style uniform for conv, BN defaults)."""
    params = []
    for i in range(len(feat_dims) - 1):
        cin, cout = feat_dims[i], feat_dims[i + 1]
        key, kw, kb = jax.random.split(key, 3)
        bound = 1.0 / (cin * kernel) ** 0.5
        w = jax.random.uniform(kw, (cout, cin, kernel), jnp.float32, -bound, bound)
        b = jax.random.uniform(kb, (cout,), jnp.float32, -bound, bound)
        bn = dict(
            gamma=jnp.ones((cout,), jnp.float32),
            beta=jnp.zeros((cout,), jnp.float32),
            running_mean=jnp.zeros((cout,), jnp.float32),
            running_var=jnp.ones((cout,), jnp.float32),
        )
        params.append(dict(weight=w, bias=b, bn=bn))
    return params


if __name__ == "__main__":
    key = jax.random.PRNGKey(0)
    k_x, k_p = jax.random.split(key)

    feat_dims = [4, 8, 8]           # two Conv1d layers
    batch, length = 2, 16
    x = jax.random.normal(k_x, (batch, feat_dims[0], length), jnp.float32)  # NCL

    params = init_conv1d_layer_params(k_p, feat_dims, kernel=3)

    # Default (bf16-MXU) path.
    out = conv1d_layer_forward(x, params, kernel=3, stride=1, padding=1,
                               bnrelu_final=True)
    out = jax.block_until_ready(out)
    assert out.shape == (batch, feat_dims[-1], length), out.shape
    assert bool(jnp.all(jnp.isfinite(out)))

    # Correctness: f32-compute kernel path vs pure-JAX reference (tight),
    # bf16 production path (loose, bf16 rounding).
    out_f32 = conv1d_layer_forward(x, params, kernel=3, stride=1, padding=1,
                                   bnrelu_final=True, compute_dtype=jnp.float32)
    ref = _reference_forward(x, params, kernel=3, stride=1, padding=1,
                             bnrelu_final=True)
    assert jnp.allclose(out_f32, ref, atol=2e-2, rtol=2e-2), \
        float(jnp.max(jnp.abs(out_f32 - ref)))
    assert jnp.allclose(out, ref, atol=2e-1, rtol=2e-1), \
        float(jnp.max(jnp.abs(out - ref)))

    print("KERNEL_OK")
</pallas_src>

<mosaic_0001>
module attributes {stable_mosaic.version = 11 : i64} {
  func.func @_fused_conv_stack_kernel(%arg0: i32, %arg1: memref<1x16x4xf32, #tpu.memory_space<vmem>>, %arg2: memref<384x128xbf16, #tpu.memory_space<vmem>>, %arg3: memref<1x128xf32, #tpu.memory_space<vmem>>, %arg4: memref<384x128xbf16, #tpu.memory_space<vmem>>, %arg5: memref<1x128xf32, #tpu.memory_space<vmem>>, %arg6: memref<1x16x8xf32, #tpu.memory_space<vmem>>, %arg7: memref<1x32x128xf32, #tpu.memory_space<vmem>>) attributes {dimension_semantics = [#tpu.dimension_semantics<parallel>], iteration_bounds = array<i64: 2>, scalar_prefetch = 0 : i64, scratch_operands = 1 : i64, tpu.core_type = #tpu.core_type<tc>, window_params = [{transform_indices = @transform_0, window_bounds = array<i64: 1, 16, 4>}, {pipeline_mode = #tpu.pipeline_mode<synchronous>, transform_indices = @transform_1, window_bounds = array<i64: 384, 128>}, {pipeline_mode = #tpu.pipeline_mode<synchronous>, transform_indices = @transform_2, window_bounds = array<i64: 1, 128>}, {pipeline_mode = #tpu.pipeline_mode<synchronous>, transform_indices = @transform_3, window_bounds = array<i64: 384, 128>}, {pipeline_mode = #tpu.pipeline_mode<synchronous>, transform_indices = @transform_4, window_bounds = array<i64: 1, 128>}, {transform_indices = @transform_5, window_bounds = array<i64: 1, 16, 8>}]} {
    %cst = arith.constant 0.000000e+00 : f32
    %0 = vector.broadcast %cst : f32 to vector<1x1x128xf32>
    %c0 = arith.constant 0 : index
    %c7 = arith.constant 7 : index
    %c0_0 = arith.constant 0 : index
    %1 = vector.load %arg7[%c0, %c7, %c0_0] : memref<1x32x128xf32, #tpu.memory_space<vmem>>, vector<1x1x128xf32>
    tpu.vector_store %arg7[%c0, %c7, %c0_0], %0 {strides = array<i32>} : memref<1x32x128xf32, #tpu.memory_space<vmem>>, vector<1x1x128xf32>,
    %cst_1 = arith.constant 0.000000e+00 : f32
    %2 = vector.broadcast %cst_1 : f32 to vector<1x17x128xf32>
    %c0_2 = arith.constant 0 : index
    %c8 = arith.constant 8 : index
    %c0_3 = arith.constant 0 : index
    %3 = vector.load %arg7[%c0_2, %c8, %c0_3] : memref<1x32x128xf32, #tpu.memory_space<vmem>>, vector<1x17x128xf32>
    tpu.vector_store %arg7[%c0_2, %c8, %c0_3], %2 {strides = array<i32>} : memref<1x32x128xf32, #tpu.memory_space<vmem>>, vector<1x17x128xf32>,
    %c0_4 = arith.constant 0 : index
    %c0_5 = arith.constant 0 : index
    %c0_6 = arith.constant 0 : index
    %4 = vector.load %arg1[%c0_4, %c0_5, %c0_6] : memref<1x16x4xf32, #tpu.memory_space<vmem>>, vector<1x16x4xf32>
    %c0_7 = arith.constant 0 : index
    %c8_8 = arith.constant 8 : index
    %c0_9 = arith.constant 0 : index
    %5 = vector.load %arg7[%c0_7, %c8_8, %c0_9] : memref<1x32x128xf32, #tpu.memory_space<vmem>>, vector<1x16x4xf32>
    tpu.vector_store %arg7[%c0_7, %c8_8, %c0_9], %4 {strides = array<i32>} : memref<1x32x128xf32, #tpu.memory_space<vmem>>, vector<1x16x4xf32>,
    %c0_10 = arith.constant 0 : index
    %c7_11 = arith.constant 7 : index
    %c0_12 = arith.constant 0 : index
    %6 = vector.load %arg7[%c0_10, %c7_11, %c0_12] : memref<1x32x128xf32, #tpu.memory_space<vmem>>, vector<1x16x128xf32>
    %c0_13 = arith.constant 0 : index
    %c8_14 = arith.constant 8 : index
    %c0_15 = arith.constant 0 : index
    %7 = vector.load %arg7[%c0_13, %c8_14, %c0_15] : memref<1x32x128xf32, #tpu.memory_space<vmem>>, vector<1x16x128xf32>
    %c0_16 = arith.constant 0 : index
    %c9 = arith.constant 9 : index
    %c0_17 = arith.constant 0 : index
    %8 = vector.load %arg7[%c0_16, %c9, %c0_17] : memref<1x32x128xf32, #tpu.memory_space<vmem>>, vector<1x16x128xf32>
    %9 = tpu.concatenate %6, %7, %8 in 2 : vector<1x16x128xf32>, vector<1x16x128xf32>, vector<1x16x128xf32> -> vector<1x16x384xf32>
    %10 = vector.shape_cast %9 : vector<1x16x384xf32> to vector<16x384xf32>
    %11 = arith.truncf %10 : vector<16x384xf32> to vector<16x384xbf16>
    %c0_18 = arith.constant 0 : index
    %c0_19 = arith.constant 0 : index
    %12 = vector.load %arg2[%c0_18, %c0_19] : memref<384x128xbf16, #tpu.memory_space<vmem>>, vector<384x128xbf16>
    %cst_20 = arith.constant dense<0.000000e+00> : vector<16x128xf32>
    %13 = tpu.matmul %11, %12, %cst_20 {dimension_numbers = #tpu.dot_dimension_numbers<[1], [0], [0], [1], [0, 0, 1, 1], [], []>} : vector<16x384xbf16>, vector<384x128xbf16>, vector<16x128xf32> -> vector<16x128xf32>
    %c0_21 = arith.constant 0 : index
    %c0_22 = arith.constant 0 : index
    %14 = vector.load %arg3[%c0_21, %c0_22] : memref<1x128xf32, #tpu.memory_space<vmem>>, vector<1x128xf32>
    %15 = vector.broadcast %14 : vector<1x128xf32> to vector<16x128xf32>
    %16 = arith.addf %13, %15 : vector<16x128xf32>
    %cst_23 = arith.constant 0.000000e+00 : f32
    %17 = vector.broadcast %cst_23 : f32 to vector<16x128xf32>
    %18 = arith.maximumf %16, %17 : vector<16x128xf32>
    %19 = vector.shape_cast %18 : vector<16x128xf32> to vector<1x16x128xf32>
    %c0_24 = arith.constant 0 : index
    %c8_25 = arith.constant 8 : index
    %c0_26 = arith.constant 0 : index
    %20 = vector.load %arg7[%c0_24, %c8_25, %c0_26] : memref<1x32x128xf32, #tpu.memory_space<vmem>>, vector<1x16x128xf32>
    tpu.vector_store %arg7[%c0_24, %c8_25, %c0_26], %19 {strides = array<i32>} : memref<1x32x128xf32, #tpu.memory_space<vmem>>, vector<1x16x128xf32>,
    %c0_27 = arith.constant 0 : index
    %c7_28 = arith.constant 7 : index
    %c0_29 = arith.constant 0 : index
    %21 = vector.load %arg7[%c0_27, %c7_28, %c0_29] : memref<1x32x128xf32, #tpu.memory_space<vmem>>, vector<1x16x128xf32>
    %c0_30 = arith.constant 0 : index
    %c8_31 = arith.constant 8 : index
    %c0_32 = arith.constant 0 : index
    %22 = vector.load %arg7[%c0_30, %c8_31, %c0_32] : memref<1x32x128xf32, #tpu.memory_space<vmem>>, vector<1x16x128xf32>
    %c0_33 = arith.constant 0 : index
    %c9_34 = arith.constant 9 : index
    %c0_35 = arith.constant 0 : index
    %23 = vector.load %arg7[%c0_33, %c9_34, %c0_35] : memref<1x32x128xf32, #tpu.memory_space<vmem>>, vector<1x16x128xf32>
    %24 = tpu.concatenate %21, %22, %23 in 2 : vector<1x16x128xf32>, vector<1x16x128xf32>, vector<1x16x128xf32> -> vector<1x16x384xf32>
    %25 = vector.shape_cast %24 : vector<1x16x384xf32> to vector<16x384xf32>
    %26 = arith.truncf %25 : vector<16x384xf32> to vector<16x384xbf16>
    %c0_36 = arith.constant 0 : index
    %c0_37 = arith.constant 0 : index
    %27 = vector.load %arg4[%c0_36, %c0_37] : memref<384x128xbf16, #tpu.memory_space<vmem>>, vector<384x128xbf16>
    %cst_38 = arith.constant dense<0.000000e+00> : vector<16x128xf32>
    %28 = tpu.matmul %26, %27, %cst_38 {dimension_numbers = #tpu.dot_dimension_numbers<[1], [0], [0], [1], [0, 0, 1, 1], [], []>} : vector<16x384xbf16>, vector<384x128xbf16>, vector<16x128xf32> -> vector<16x128xf32>
    %c0_39 = arith.constant 0 : index
    %c0_40 = arith.constant 0 : index
    %29 = vector.load %arg5[%c0_39, %c0_40] : memref<1x128xf32, #tpu.memory_space<vmem>>, vector<1x128xf32>
    %30 = vector.broadcast %29 : vector<1x128xf32> to vector<16x128xf32>
    %31 = arith.addf %28, %30 : vector<16x128xf32>
    %cst_41 = arith.constant 0.000000e+00 : f32
    %32 = vector.broadcast %cst_41 : f32 to vector<16x128xf32>
    %33 = arith.maximumf %31, %32 : vector<16x128xf32>
    %34 = vector.shape_cast %33 : vector<16x128xf32> to vector<1x16x128xf32>
    %35 = vector.extract_strided_slice %34 {offsets = [0, 0, 0], sizes = [1, 16, 8], strides = [1, 1, 1]} : vector<1x16x128xf32> to vector<1x16x8xf32>
    %c0_42 = arith.constant 0 : index
    %c0_43 = arith.constant 0 : index
    %c0_44 = arith.constant 0 : index
    %36 = vector.load %arg6[%c0_42, %c0_43, %c0_44] : memref<1x16x8xf32, #tpu.memory_space<vmem>>, vector<1x16x8xf32>
    tpu.vector_store %arg6[%c0_42, %c0_43, %c0_44], %35 {strides = array<i32>} : memref<1x16x8xf32, #tpu.memory_space<vmem>>, vector<1x16x8xf32>,
    return
  }
  func.func @transform_0(%arg0: i32) -> (i32, i32, i32) {
    %c0_i32 = arith.constant 0 : i32
    %c0_i32_0 = arith.constant 0 : i32
    %c0_i32_1 = arith.constant 0 : i32
    return %arg0, %c0_i32, %c0_i32_0 : i32, i32, i32
  }
  func.func @transform_1(%arg0: i32) -> (i32, i32) {
    %c0_i32 = arith.constant 0 : i32
    %c0_i32_0 = arith.constant 0 : i32
    %c0_i32_1 = arith.constant 0 : i32
    return %c0_i32, %c0_i32_0 : i32, i32
  }
  func.func @transform_2(%arg0: i32) -> (i32, i32) {
    %c0_i32 = arith.constant 0 : i32
    %c0_i32_0 = arith.constant 0 : i32
    %c0_i32_1 = arith.constant 0 : i32
    return %c0_i32, %c0_i32_0 : i32, i32
  }
  func.func @transform_3(%arg0: i32) -> (i32, i32) {
    %c0_i32 = arith.constant 0 : i32
    %c0_i32_0 = arith.constant 0 : i32
    %c0_i32_1 = arith.constant 0 : i32
    return %c0_i32, %c0_i32_0 : i32, i32
  }
  func.func @transform_4(%arg0: i32) -> (i32, i32) {
    %c0_i32 = arith.constant 0 : i32
    %c0_i32_0 = arith.constant 0 : i32
    %c0_i32_1 = arith.constant 0 : i32
    return %c0_i32, %c0_i32_0 : i32, i32
  }
  func.func @transform_5(%arg0: i32) -> (i32, i32, i32) {
    %c0_i32 = arith.constant 0 : i32
    %c0_i32_0 = arith.constant 0 : i32
    %c0_i32_1 = arith.constant 0 : i32
    return %arg0, %c0_i32, %c0_i32_0 : i32, i32, i32
  }
}

</mosaic_0001>

<bundles_post_ra>
// kernel: tpu_custom_call.1
= control target key start
LH: loop header
LB: loop body
LE: loop exit
PB: predicated region body
PF: predicated region fallthrough
CT: control target
= control target key end

     0   :  { %10 = vsyncpa [#allocation4], 0  ;;  %s1309_s0 = inlined_call_operand.vmem [shape: f32[2,16,4], index: 0, kind: input, shape index: {}]   ;;  %s1310_s1 = inlined_call_operand.hbm [shape: bf16[384,128], index: 1, kind: input, shape index: {}]   ;;  %s1311_s2 = inlined_call_operand.vmem [shape: f32[1,128], index: 2, kind: input, shape index: {}]   ;;  %s1312_s3 = inlined_call_operand.hbm [shape: bf16[384,128], index: 3, kind: input, shape index: {}]   ;;  %s1313_s4 = inlined_call_operand.vmem [shape: f32[1,128], index: 4, kind: input, shape index: {}]   ;;  %s1314_s5 = inlined_call_operand.vmem [shape: f32[2,16,8], index: 5, kind: output, shape index: {}]  }
   0x1   :  { %11 = vsyncpa [#allocation6], 0  ;;  %s1250_s18 = smov 0  }
   0x2 LB: > { %s169_s21 = sshll.u32 %s1310_s1, 4  ;;  %s1259_s22 = sadd.s32 4294967295, %s1213_s18   ;;  %s1213_s18 = sphi %s1250_s18, %s17_s18   ;;  %s170_s21 = int_to_ptr.hbm [resolvable:$true] %s169_s21 }
   0x3   : > { %p850_p0 = scmp.ge.s32.totalorder %s1213_s18, 1  ;;  %p158_p1 = scmp.lt.s32.totalorder %s1213_s18, 3 }
   0x4   : > { %p1120_p2 = scmp.eq.s32.totalorder %s1259_s22, 0  ;;  %s1215_s24 = smov [#allocation3]  }
   0x5   : > { %p1264_p3 = pnand %p850_p0, %p158_p1  ;;  %s171_s25 = sshll.u32 %s1215_s24, 4  ;;  %s172_s25 = int_to_ptr.vmem [resolvable:$true] %s171_s25 }
   0x6   : > { %s186_s28 = sshll.u32 %s1312_s3, 4  ;;  %s1216_s29 = smov [#allocation5]   ;;  %s187_s28 = int_to_ptr.hbm [resolvable:$true] %s186_s28 }
   0x7   : > { %p1113_p4 = pneg %p1264_p3  ;;  %s188_s30 = sshll.u32 %s1216_s29, 4  ;;  %s189_s30 = int_to_ptr.vmem [resolvable:$true] %s188_s30 }
   0x8   : > { %s1217_s6 = smov 64   ;;  %s1218_s7 = smov 4  }
   0x9   : > { %p1114_p5 = pnand %p1120_p2, %p1113_p4  ;;  %215 = sbr.rel (%p1264_p3) target bundleno = 354 (0x162), region = 40 }
   0xb   : > { %1116 = dma.hbm_to_vmem [thread:$0]  (!%p1114_p5), %s170_s21, 3072, %s172_s25, [#allocation4], %s1217_s6, %s1217_s6, %s1218_s7  }
   0xc   : > { %1119 = dma.hbm_to_vmem [thread:$0]  (!%p1114_p5), %s187_s28, 3072, %s189_s30, [#allocation6], %s1217_s6, %s1217_s6, %s1218_s7  }
   0xe   : > { %1204 = dma.done.wait (%p1120_p2), [#allocation4], 3072  }
   0xf   : > { %1206 = vsyncadd (%p1120_p2), [#allocation4], 4294964224 }
  0x10   : > { %1208 = dma.done.wait (%p1120_p2), [#allocation6], 3072  }
  0x11   : > { %1210 = vsyncadd (%p1120_p2), [#allocation6], 4294964224  ;;  %p249_p6 = scmp.lt.s32.totalorder %s1259_s22, 1  ;;  %v1219_v0 = vmov 0.0   ;;  %v1064_v1 = vld [vmem:[#allocation3 + $0x38] sm:$0xff]  ;;  %v1063_v4 = vld [vmem:[#allocation3 + $0x30] sm:$0xff] }
  0x12   : > { %259 = vst [vmem:[#allocation2 + $0x7] sm:$0x1] %v1219_v0  ;;  %v1072_v2 = vld [vmem:[#allocation3 + $0x78] sm:$0xff]  ;;  %473 = vmatpush.bf16.msra.mxu0 %v1064_v1  ;;  %v1071_v5 = vld [vmem:[#allocation3 + $0x70] sm:$0xff]  ;;  %v1062_v7 = vld [vmem:[#allocation3 + $0x28] sm:$0xff]  ;;  %vm265_vm0 = vcmask 31744  }
  0x13   : > { %260 = vst [vmem:[#allocation2 + $0x8] sm:$0xff] %v1219_v0  ;;  %s1317_s22 = smov (!%p249_p6, %s1259_s22), 1  ;;  %v1080_v3 = vld [vmem:[#allocation3 + $0xb8] sm:$0xff]  ;;  %487 = vmatpush.bf16.msra.mxu1 %v1072_v2  ;;  %v1079_v6 = vld [vmem:[#allocation3 + $0xb0] sm:$0xff]  ;;  %v1070_v8 = vld [vmem:[#allocation3 + $0x68] sm:$0xff]  ;;  %vm768_vm1 = vcmask 64512  }
  0x14   : > { %261 = vst [vmem:[#allocation2 + $0x10] sm:$0xff] %v1219_v0  ;;  %s1055_s8 = sshll.u32 %s1317_s22, 4  ;;  %501 = vmatpush.bf16.msra.mxu2 %v1080_v3  ;;  %v1078_v9 = vld [vmem:[#allocation3 + $0xa8] sm:$0xff]  ;;  %v1088_v12 = vld [vmem:[#allocation5 + $0x38] sm:$0xff]  ;;  %v1061_v13 = vld [vmem:[#allocation3 + $0x20] sm:$0xff] }
  0x15   : > { %262 = vst [vmem:[#allocation2 + $0x18] sm:$0x1] %v1219_v0  ;;  %s253_s11 = scalar_lea.vmem %s1309_s0, %s1055_s8  ;;  %v1069_v14 = vld [vmem:[#allocation3 + $0x60] sm:$0xff]  ;;  %724 = vmatpush.bf16.msra.mxu3 %v1088_v12  ;;  %v1060_v16 = vld [vmem:[#allocation3 + $0x18] sm:$0xff]  ;;  %v1059_v19 = vld [vmem:[#allocation3 + $0x10] sm:$0xff]  ;;  %s258_s19 = scalar_lea.vmem %s1314_s5, %s1055_s8 }
  0x16   : > { %474 = vmatpush.bf16.msra.mxu0 %v1063_v4  ;;  %v263_v10 = vld [vmem:[%s253_s11] sm:$0xff]  ;;  %v264_v11 = vld [vmem:[%s253_s11 + $0x8] sm:$0xff]  ;;  %v1068_v17 = vld [vmem:[#allocation3 + $0x58] sm:$0xff] }
  0x17   : > { %488 = vmatpush.bf16.msra.mxu1 %v1071_v5  ;;  %266 = vst.msk [vmem:[#allocation2 + $0x8] sm:$0xff] %vm265_vm0, %v263_v10  ;;  %v1077_v15 = vld [vmem:[#allocation3 + $0xa0] sm:$0xff]  ;;  %v1076_v18 = vld [vmem:[#allocation3 + $0x98] sm:$0xff]  ;;  %v1067_v20 = vld [vmem:[#allocation3 + $0x50] sm:$0xff] }
  0x18   : > { %502 = vmatpush.bf16.msra.mxu2 %v1079_v6  ;;  %267 = vst.msk [vmem:[#allocation2 + $0x10] sm:$0xff] %vm265_vm0, %v264_v11  ;;  %v1075_v21 = vld [vmem:[#allocation3 + $0x90] sm:$0xff]  ;;  %v1058_v22 = vld [vmem:[#allocation3 + $0x8] sm:$0xff]  ;;  %v1057_v25 = vld [vmem:[#allocation3] sm:$0xff] }
  0x19   : > { %v1066_v23 = vld [vmem:[#allocation3 + $0x48] sm:$0xff]  ;;  %v1065_v26 = vld [vmem:[#allocation3 + $0x40] sm:$0xff]  ;;  %v1096_v34 = vld [vmem:[#allocation5 + $0x78] sm:$0xff] }
  0x1a   : > { %475 = vmatpush.bf16.msra.mxu0 %v1062_v7  ;;  %v1074_v24 = vld [vmem:[#allocation3 + $0x88] sm:$0xff]  ;;  %v1073_v27 = vld [vmem:[#allocation3 + $0x80] sm:$0xff]  ;;  %v1104_v35 = vld [vmem:[#allocation5 + $0xb8] sm:$0xff] }
  0x1b   : > { %489 = vmatpush.bf16.msra.mxu1 %v1070_v8  ;;  %v1095_v39 = vld [vmem:[#allocation5 + $0x70] sm:$0xff]  ;;  %v1094_v40 = vld [vmem:[#allocation5 + $0x68] sm:$0xff]  ;;  %v1093_v43 = vld [vmem:[#allocation5 + $0x60] sm:$0xff] }
  0x1c   : > { %503 = vmatpush.bf16.msra.mxu2 %v1078_v9  ;;  %v1087_v41 = vld [vmem:[#allocation5 + $0x30] sm:$0xff]  ;;  %v1086_v44 = vld [vmem:[#allocation5 + $0x28] sm:$0xff]  ;;  %v1092_v46 = vld [vmem:[#allocation5 + $0x58] sm:$0xff] }
  0x1d   : > { %v1103_v42 = vld [vmem:[#allocation5 + $0xb0] sm:$0xff]  ;;  %725 = vmatpush.bf16.msra.mxu3 %v1087_v41  ;;  %v1102_v45 = vld [vmem:[#allocation5 + $0xa8] sm:$0xff]  ;;  %v1085_v47 = vld [vmem:[#allocation5 + $0x20] sm:$0xff] }
  0x1e   : > { %476 = vmatpush.bf16.msra.mxu0 %v1061_v13  ;;  %v268_v28 = vld [vmem:[#allocation2 + $0x7] sm:$0xff]  ;;  %v1091_v49 = vld [vmem:[#allocation5 + $0x50] sm:$0xff]  ;;  %v1084_v50 = vld [vmem:[#allocation5 + $0x18] sm:$0xff] }
  0x1f   : > { %490 = vmatpush.bf16.msra.mxu1 %v1069_v14  ;;  %v269_v29 = vld [vmem:[#allocation2 + $0xf] sm:$0xff]  ;;  %v1101_v48 = vld [vmem:[#allocation5 + $0xa0] sm:$0xff]  ;;  %v1100_v51 = vld [vmem:[#allocation5 + $0x98] sm:$0xff] }
  0x20   : > { %504 = vmatpush.bf16.msra.mxu2 %v1077_v15  ;;  %v270_v30 = vld [vmem:[#allocation2 + $0x8] sm:$0xff]  ;;  %v271_v31 = vld [vmem:[#allocation2 + $0x10] sm:$0xff]  ;;  %v274_v36 = vpack.c.bf16 %v269_v29, %v268_v28  ;;  %v1089_v55 = vld [vmem:[#allocation5 + $0x40] sm:$0xff] }
  0x21   : > { %v272_v32 = vld [vmem:[#allocation2 + $0x9] sm:$0xff]  ;;  %v273_v33 = vld [vmem:[#allocation2 + $0x11] sm:$0xff]  ;;  %v275_v37 = vpack.c.bf16 %v271_v31, %v270_v30  ;;  %726 = vmatpush.bf16.msra.mxu3 %v1086_v44  ;;  %v1081_v58 = vld [vmem:[#allocation5] sm:$0xff] }
  0x22   : > { %477 = vmatpush.bf16.msra.mxu0 %v1060_v16  ;;  %v276_v38 = vpack.c.bf16 %v273_v33, %v272_v32  ;;  %v1090_v52 = vld [vmem:[#allocation5 + $0x48] sm:$0xff]  ;;  %v1083_v53 = vld [vmem:[#allocation5 + $0x10] sm:$0xff]  ;;  %v1097_v59 = vld [vmem:[#allocation5 + $0x80] sm:$0xff] }
  0x23   : > { %491 = vmatpush.bf16.msra.mxu1 %v1068_v17  ;;  %v1099_v54 = vld [vmem:[#allocation5 + $0x90] sm:$0xff]  ;;  %v1082_v56 = vld [vmem:[#allocation5 + $0x8] sm:$0xff]  ;;  %v1137_v60 = vld [vmem:[%s1311_s2] ss:$0 sm:$0xff] }
  0x24   : > { %505 = vmatpush.bf16.msra.mxu2 %v1076_v18  ;;  %v1098_v57 = vld [vmem:[#allocation5 + $0x88] sm:$0xff]  ;;  %v1138_v18 = vld [vmem:[%s1313_s4] ss:$0 sm:$0xff] }
  0x25   : > { %727 = vmatpush.bf16.msra.mxu3 %v1085_v47 }
  0x26   : > { %478 = vmatpush.bf16.msra.mxu0 %v1059_v19 }
  0x27   : > { %492 = vmatpush.bf16.msra.mxu1 %v1067_v20 }
  0x28   : > { %506 = vmatpush.bf16.msra.mxu2 %v1075_v21 }
  0x29   : > { %728 = vmatpush.bf16.msra.mxu3 %v1084_v50 }
  0x2a   : > { %479 = vmatpush.bf16.msra.mxu0 %v1058_v22 }
  0x2b   : > { %493 = vmatpush.bf16.msra.mxu1 %v1066_v23 }
  0x2c   : > { %507 = vmatpush.bf16.msra.mxu2 %v1074_v24 }
  0x2d   : > { %729 = vmatpush.bf16.msra.mxu3 %v1083_v53 }
  0x2e   : > { %480 = vmatpush.bf16.msra.mxu0 %v1057_v25 }
  0x2f   : > { %494 = vmatpush.bf16.msra.mxu1 %v1065_v26 }
  0x30   : > { %508 = vmatpush.bf16.msra.mxu2 %v1073_v27 }
  0x31   : > { %481 = vmatmul.bf16.vlgmr.msra.gmra.mxu0 %v274_v36  ;;  %730 = vmatpush.bf16.msra.mxu3 %v1082_v56 }
  0x32   : > { %738 = vmatpush.bf16.msrb.mxu0 %v1096_v34  ;;  %495 = vmatmul.bf16.vlgmr.msra.gmra.mxu1 %v275_v37 }
  0x33   : > { %752 = vmatpush.bf16.msrb.mxu1 %v1104_v35  ;;  %509 = vmatmul.bf16.vlgmr.msra.gmra.mxu2 %v276_v38 }
  0x35   : > { %731 = vmatpush.bf16.msra.mxu3 %v1081_v58 }
  0x36   : > { %739 = vmatpush.bf16.msrb.mxu0 %v1095_v39 }
  0x37   : > { %753 = vmatpush.bf16.msrb.mxu1 %v1103_v42 }
  0x3a   : > { %740 = vmatpush.bf16.msrb.mxu0 %v1094_v40 }
  0x3b   : > { %754 = vmatpush.bf16.msrb.mxu1 %v1102_v45 }
  0x3e   : > { %741 = vmatpush.bf16.msrb.mxu0 %v1093_v43 }
  0x3f   : > { %755 = vmatpush.bf16.msrb.mxu1 %v1101_v48 }
  0x42   : > { %742 = vmatpush.bf16.msrb.mxu0 %v1092_v46 }
  0x43   : > { %756 = vmatpush.bf16.msrb.mxu1 %v1100_v51 }
  0x46   : > { %743 = vmatpush.bf16.msrb.mxu0 %v1091_v49 }
  0x47   : > { %757 = vmatpush.bf16.msrb.mxu1 %v1099_v54 }
  0x4a   : > { %744 = vmatpush.bf16.msrb.mxu0 %v1090_v52 }
  0x4b   : > { %758 = vmatpush.bf16.msrb.mxu1 %v1098_v57 }
  0x4e   : > { %745 = vmatpush.bf16.msrb.mxu0 %v1089_v55 }
  0x4f   : > { %759 = vmatpush.bf16.msrb.mxu1 %v1097_v59 }
  0xae   : > { %v482_v61 = vpop.f32.mrf.mxu0 }
  0xaf   : > { %v483_v62 = vadd.f32 %v1137_v60, %v482_v61  ;;  %v496_v63 = vpop.f32.mrf.mxu1 }
  0xb1   : > { %v497_v0 = vadd.f32 %v496_v63, %v483_v62 }
  0xb6   : > { %v510_v1 = vpop.f32.mrf.mxu2  ;;  %v484_v3 = vpop.f32.mrf.mxu0 }
  0xb7   : > { %v511_v2 = vadd.f32 %v510_v1, %v497_v0  ;;  %v485_v5 = vadd.f32 %v1137_v60, %v484_v3  ;;  %v498_v6 = vpop.f32.mrf.mxu1 }
  0xb9   : > { %v515_v4 = vmax.f32 %v511_v2, 0.0  ;;  %v499_v7 = vadd.f32 %v498_v6, %v485_v5 }
  0xbb   : > { %517 = vst [vmem:[#allocation2 + $0x8] sm:$0xff] %v515_v4 }
  0xbe   : > { %v512_v8 = vpop.f32.mrf.mxu2 }
  0xbf   : > { %v513_v9 = vadd.f32 %v512_v8, %v499_v7 }
  0xc1   : > { %v516_v10 = vmax.f32 %v513_v9, 0.0 }
  0xc2   : > { %v519_v12 = vld [vmem:[#allocation2 + $0x7] sm:$0xff] }
  0xc3   : > { %518 = vst [vmem:[#allocation2 + $0x10] sm:$0xff] %v516_v10  ;;  %v526_v11 = vpack.c.bf16 %v516_v10, %v515_v4 }
  0xc5   : > { %746 = vmatmul.bf16.vlgmr.msrb.gmra.mxu0 %v526_v11 }
  0xca   : > { %v520_v13 = vld [vmem:[#allocation2 + $0xf] sm:$0xff] }
  0xcb   : > { %v523_v14 = vld [vmem:[#allocation2 + $0x9] sm:$0xff]  ;;  %v524_v15 = vld [vmem:[#allocation2 + $0x11] sm:$0xff]  ;;  %v525_v16 = vpack.c.bf16 %v520_v13, %v519_v12 }
  0xcc   : > { %v527_v17 = vpack.c.bf16 %v524_v15, %v523_v14 }
  0xcd   : > { %732 = vmatmul.bf16.vlgmr.msra.gmra.mxu3 %v525_v16 }
  0xce   : > { %760 = vmatmul.bf16.vlgmr.msrb.gmra.mxu1 %v527_v17 }
 0x142   : > { %v747_v19 = vpop.f32.mrf.mxu0 }
 0x14a   : > { %v749_v28 = vpop.f32.mrf.mxu0 }
 0x14b   : > { %v761_v22 = vpop.f32.mrf.mxu1 }
 0x150   : > { %v733_v20 = vpop.f32.mrf.mxu3 }
 0x151   : > { %v734_v21 = vadd.f32 %v1138_v18, %v733_v20 }
 0x153   : > { %v748_v23 = vadd.f32 %v747_v19, %v734_v21  ;;  %v763_v30 = vpop.f32.mrf.mxu1 }
 0x155   : > { %v762_v24 = vadd.f32 %v761_v22, %v748_v23 }
 0x157   : > { %v766_v25 = vmax.f32 %v762_v24, 0.0 }
 0x158   : > { %v735_v26 = vpop.f32.mrf.mxu3 }
 0x159   : > { %769 = vst.msk [vmem:[%s258_s19] sm:$0xff] %vm768_vm1, %v766_v25  ;;  %v736_v27 = vadd.f32 %v1138_v18, %v735_v26 }
 0x15b   : > { %v750_v29 = vadd.f32 %v749_v28, %v736_v27 }
 0x15d   : > { %v764_v31 = vadd.f32 %v763_v30, %v750_v29 }
 0x15f   : > { %v767_v32 = vmax.f32 %v764_v31, 0.0 }
 0x161   : > { %770 = vst.msk [vmem:[%s258_s19 + $0x8] sm:$0xff] %vm768_vm1, %v767_v32 }
 0x162 PF: > { %s17_s18 = sadd.s32 1, %s1213_s18  }
 0x163   : > { %p14_p7 = scmp.ge.s32.totalorder %s17_s18, 4  }
 0x165   :  { %16 = sbr.rel (!%p14_p7) target bundleno = 2 (0x2), region = 79 }
 0x16a   :  { %792 = vsyncpa [#allocation4], 1 }
 0x16b   :  { %794 = vsyncpa [#allocation4 + $0x1], 1 }
 0x16c   :  { %795 = vsyncpa [#allocation6], 1 }

</bundles_post_ra>
